<compile_context>
chip_gen: v5e
topology: v5e:2x2
jax: 0.10.0
libtpu: 0.0.40
codegen_flags: <defaults>
</compile_context>

<pallas_src>
import functools
import math

import jax
import jax.numpy as jnp
from jax import lax
from jax.experimental import pallas as pl
from jax.experimental.pallas import tpu as pltpu


def _mha_kernel(x_ref, wqkv_ref, wp_ref, bp_ref, o_ref, ctx_ref, *, num_heads):
    # x_ref    : (T, E)    rows of one batch element (compute dtype)
    # wqkv_ref : (E, 3E)   columns = [Wq heads | Wk heads | Wv heads]
    # wp_ref   : (E, E)    output projection (y = x @ Wp)
    # bp_ref   : (1, E)    output projection bias
    # o_ref    : (T, E)    output rows of the same batch element
    # ctx_ref  : (T, E)    f32 VMEM scratch — concatenated head outputs
    T, E = x_ref.shape
    H = num_heads
    Hs = E // H

    x_b = x_ref[...]                                          # keep input dtype

    # Fused QKV projection for this batch element: one lane-dense matmul.
    # f32 accumulation, then narrow back to the compute dtype so the attention
    # matmuls below run at native MXU throughput (bf16 etc.).
    qkv = jnp.dot(x_b, wqkv_ref[...],
                  preferred_element_type=jnp.float32).astype(x_b.dtype)  # (T, 3E)

    # Additive causal bias, built once per step (VPU add fuses with the score
    # epilogue; large finite negative avoids inf-inf NaNs on fully-masked rows).
    row = lax.broadcasted_iota(jnp.int32, (T, T), 0)
    col = lax.broadcasted_iota(jnp.int32, (T, T), 1)
    bias = jnp.where(row >= col, 0.0, -1e30).astype(jnp.float32)          # (T, T)

    for h in range(H):                                        # H small & static
        q = qkv[:, h * Hs:(h + 1) * Hs]                       # (T, Hs)
        k = qkv[:, E + h * Hs:E + (h + 1) * Hs]               # (T, Hs)
        v = qkv[:, 2 * E + h * Hs:2 * E + (h + 1) * Hs]       # (T, Hs)

        # NOTE: reference module applies NO 1/sqrt(head_size) scaling.
        # q @ k^T with the transpose folded into MXU operand loading.
        wei = lax.dot_general(q, k, (((1,), (1,)), ((), ())),
                              preferred_element_type=jnp.float32)          # (T, T)
        wei = wei + bias

        # softmax over last dim in f32; denominator reciprocal goes to the EUP.
        m = jnp.max(wei, axis=-1, keepdims=True)
        e = jnp.exp(wei - m)
        p = e * pl.reciprocal(jnp.sum(e, axis=-1, keepdims=True), approx=True)

        # dropout: identity in eval mode.
        # P @ V in the compute dtype, f32 accumulation, stored in place into the
        # scratch accumulator (replaces jnp.concatenate; bounds live ranges).
        ctx_ref[:, h * Hs:(h + 1) * Hs] = jnp.dot(
            p.astype(v.dtype), v, preferred_element_type=jnp.float32)

    # Single output projection: concat(heads) @ Wp + b, fused into one matmul.
    ctx = ctx_ref[...].astype(wp_ref.dtype)
    out = jnp.dot(ctx, wp_ref[...],
                  preferred_element_type=jnp.float32) + bp_ref[...]
    o_ref[...] = out.astype(o_ref.dtype)


def masked_multihead_attention(x, wq, wk, wv, wp, bp):
    """x: (B, T, E); wq/wk/wv: (H, E, Hs); wp: (E, E) (y = x @ Wp); bp: (E,)."""
    B, T, E = x.shape
    H, _, Hs = wq.shape

    # Pack per-head QKV weights into one (E, 3E) matrix -> one DMA, one matmul
    # per grid step.  Head-major along lanes so per-head column slices are
    # contiguous and the concat order matches the PyTorch module.
    def pack(w):  # (H, E, Hs) -> (E, H*Hs)
        return jnp.transpose(w, (1, 0, 2)).reshape(E, H * Hs)

    w_qkv = jnp.concatenate([pack(wq), pack(wk), pack(wv)], axis=-1)       # (E, 3E)
    bp2 = bp.reshape(1, E)

    # Layout plumbing stays in the wrapper (free for XLA, costly in-kernel).
    x2d = x.reshape(B * T, E)

    kernel = functools.partial(_mha_kernel, num_heads=H)

    out2d = pl.pallas_call(
        kernel,
        out_shape=jax.ShapeDtypeStruct((B * T, E), x.dtype),
        grid_spec=pltpu.PrefetchScalarGridSpec(
            num_scalar_prefetch=0,
            grid=(B,),                                   # one batch element / step
            in_specs=[
                pl.BlockSpec((T, E), lambda b: (b, 0)),          # x rows of batch b
                pl.BlockSpec((E, 3 * E), lambda b: (0, 0)),      # VMEM-resident
                pl.BlockSpec((E, E), lambda b: (0, 0)),          # VMEM-resident
                pl.BlockSpec((1, E), lambda b: (0, 0)),          # VMEM-resident
            ],
            out_specs=pl.BlockSpec((T, E), lambda b: (b, 0)),
            scratch_shapes=[pltpu.VMEM((T, E), jnp.float32)],    # head-concat acc
        ),
        compiler_params=pltpu.CompilerParams(
            # Parallel batch axis: megacore sharding on v7x, neutral on v5e/v6e.
            dimension_semantics=("parallel",),
            # Safe on all of v5e/v6e/v7x (above v5e's 16 MiB scoped default,
            # within v7x's 64 MiB physical with double-buffer headroom).
            vmem_limit_bytes=32 * 1024 * 1024,
        ),
    )(x2d, w_qkv, wp, bp2)

    return out2d.reshape(B, T, E)


def _reference(x, wq, wk, wv, wp, bp):
    """Pure-JAX reference mirroring the PyTorch module (eval mode)."""
    B, T, E = x.shape
    H, _, Hs = wq.shape
    outs = []
    for h in range(H):
        q = x @ wq[h]
        k = x @ wk[h]
        v = x @ wv[h]
        wei = jnp.einsum('btd,bsd->bts', q, k)
        mask = jnp.tril(jnp.ones((T, T), bool))
        wei = jnp.where(mask, wei, -jnp.inf)
        wei = jax.nn.softmax(wei, axis=-1)
        outs.append(wei @ v)
    cat = jnp.concatenate(outs, axis=-1)
    return cat @ wp + bp


if __name__ == "__main__":
    # small shapes consistent with the module
    B, T = 2, 8
    num_heads, head_size = 4, 8
    embed_size = num_heads * head_size          # 32
    block_size = T                              # tril covers full sequence

    key = jax.random.PRNGKey(0)
    kx, kq, kk, kv, kp, kb = jax.random.split(key, 6)

    bound_e = 1.0 / math.sqrt(embed_size)
    x  = jax.random.normal(kx, (B, T, embed_size), jnp.float32)
    wq = jax.random.uniform(kq, (num_heads, embed_size, head_size),
                            jnp.float32, -bound_e, bound_e)
    wk = jax.random.uniform(kk, (num_heads, embed_size, head_size),
                            jnp.float32, -bound_e, bound_e)
    wv = jax.random.uniform(kv, (num_heads, embed_size, head_size),
                            jnp.float32, -bound_e, bound_e)
    wp = jax.random.uniform(kp, (embed_size, embed_size),
                            jnp.float32, -bound_e, bound_e)
    bp = jax.random.uniform(kb, (embed_size,),
                            jnp.float32, -bound_e, bound_e)

    out = masked_multihead_attention(x, wq, wk, wv, wp, bp)
    out = jax.block_until_ready(out)

    ref = _reference(x, wq, wk, wv, wp, bp)
    assert out.shape == (B, T, embed_size)
    # Tolerance accounts for the EUP approximate reciprocal in the softmax
    # denominator (relative error ~1e-4, well inside 1e-3).
    assert jnp.allclose(out, ref, atol=1e-3, rtol=1e-3), \
        f"max abs err = {jnp.max(jnp.abs(out - ref))}"

    print("KERNEL_OK")
</pallas_src>

<mosaic_0001>
module attributes {stable_mosaic.version = 11 : i64} {
  func.func @_mha_kernel(%arg0: i32, %arg1: memref<8x32xf32, #tpu.memory_space<vmem>>, %arg2: memref<32x96xf32, #tpu.memory_space<vmem>>, %arg3: memref<32x32xf32, #tpu.memory_space<vmem>>, %arg4: memref<1x32xf32, #tpu.memory_space<vmem>>, %arg5: memref<8x32xf32, #tpu.memory_space<vmem>>, %arg6: memref<8x32xf32, #tpu.memory_space<vmem>>) attributes {dimension_semantics = [#tpu.dimension_semantics<parallel>], iteration_bounds = array<i64: 2>, scalar_prefetch = 0 : i64, scratch_operands = 1 : i64, tpu.core_type = #tpu.core_type<tc>, window_params = [{transform_indices = @transform_0, window_bounds = array<i64: 8, 32>}, {pipeline_mode = #tpu.pipeline_mode<synchronous>, transform_indices = @transform_1, window_bounds = array<i64: 32, 96>}, {pipeline_mode = #tpu.pipeline_mode<synchronous>, transform_indices = @transform_2, window_bounds = array<i64: 32, 32>}, {pipeline_mode = #tpu.pipeline_mode<synchronous>, transform_indices = @transform_3, window_bounds = array<i64: 1, 32>}, {transform_indices = @transform_4, window_bounds = array<i64: 8, 32>}]} {
    %c0 = arith.constant 0 : index
    %c0_0 = arith.constant 0 : index
    %0 = vector.load %arg1[%c0, %c0_0] : memref<8x32xf32, #tpu.memory_space<vmem>>, vector<8x32xf32>
    %c0_1 = arith.constant 0 : index
    %c0_2 = arith.constant 0 : index
    %1 = vector.load %arg2[%c0_1, %c0_2] : memref<32x96xf32, #tpu.memory_space<vmem>>, vector<32x96xf32>
    %cst = arith.constant dense<0.000000e+00> : vector<8x96xf32>
    %2 = tpu.matmul %0, %1, %cst {dimension_numbers = #tpu.dot_dimension_numbers<[1], [0], [0], [1], [0, 0, 1, 1], [], []>} : vector<8x32xf32>, vector<32x96xf32>, vector<8x96xf32> -> vector<8x96xf32>
    %3 = tpu.iota {dimensions = array<i32: 0>} : vector<8x8xi32>
    %4 = tpu.iota {dimensions = array<i32: 1>} : vector<8x8xi32>
    %5 = arith.cmpi sge, %3, %4 : vector<8x8xi32>
    %cst_3 = arith.constant 0.000000e+00 : f32
    %cst_4 = arith.constant -1.000000e+30 : f32
    %6 = vector.broadcast %cst_3 : f32 to vector<8x8xf32>
    %7 = vector.broadcast %cst_4 : f32 to vector<8x8xf32>
    %8 = arith.select %5, %6, %7 : vector<8x8xi1>, vector<8x8xf32>
    %9 = vector.extract_strided_slice %2 {offsets = [0, 0], sizes = [8, 8], strides = [1, 1]} : vector<8x96xf32> to vector<8x8xf32>
    %10 = vector.extract_strided_slice %2 {offsets = [0, 32], sizes = [8, 8], strides = [1, 1]} : vector<8x96xf32> to vector<8x8xf32>
    %11 = vector.extract_strided_slice %2 {offsets = [0, 64], sizes = [8, 8], strides = [1, 1]} : vector<8x96xf32> to vector<8x8xf32>
    %cst_5 = arith.constant dense<0.000000e+00> : vector<8x8xf32>
    %12 = tpu.matmul %9, %10, %cst_5 {dimension_numbers = #tpu.dot_dimension_numbers<[1], [1], [0], [0], [0, 0, 1, 0], [], []>} : vector<8x8xf32>, vector<8x8xf32>, vector<8x8xf32> -> vector<8x8xf32>
    %13 = arith.addf %12, %8 : vector<8x8xf32>
    %cst_6 = arith.constant dense<0xFF800000> : vector<8xf32>
    %14 = vector.multi_reduction <maximumf>, %13, %cst_6 [1] : vector<8x8xf32> to vector<8xf32>
    %15 = vector.shape_cast %14 : vector<8xf32> to vector<8x1xf32>
    %16 = vector.broadcast %15 : vector<8x1xf32> to vector<8x8xf32>
    %17 = arith.subf %13, %16 : vector<8x8xf32>
    %18 = math.exp %17 : vector<8x8xf32>
    %cst_7 = arith.constant dense<0.000000e+00> : vector<8xf32>
    %19 = vector.multi_reduction <add>, %18, %cst_7 [1] : vector<8x8xf32> to vector<8xf32>
    %20 = vector.shape_cast %19 : vector<8xf32> to vector<8x1xf32>
    %21 = tpu.reciprocal %20 {approx = true} : vector<8x1xf32> -> vector<8x1xf32>
    %22 = vector.broadcast %21 : vector<8x1xf32> to vector<8x8xf32>
    %23 = arith.mulf %18, %22 : vector<8x8xf32>
    %cst_8 = arith.constant dense<0.000000e+00> : vector<8x8xf32>
    %24 = tpu.matmul %23, %11, %cst_8 {dimension_numbers = #tpu.dot_dimension_numbers<[1], [0], [0], [1], [0, 0, 1, 1], [], []>} : vector<8x8xf32>, vector<8x8xf32>, vector<8x8xf32> -> vector<8x8xf32>
    %c0_9 = arith.constant 0 : index
    %c0_10 = arith.constant 0 : index
    %25 = vector.load %arg6[%c0_9, %c0_10] : memref<8x32xf32, #tpu.memory_space<vmem>>, vector<8x8xf32>
    tpu.vector_store %arg6[%c0_9, %c0_10], %24 {strides = array<i32>} : memref<8x32xf32, #tpu.memory_space<vmem>>, vector<8x8xf32>,
    %26 = vector.extract_strided_slice %2 {offsets = [0, 8], sizes = [8, 8], strides = [1, 1]} : vector<8x96xf32> to vector<8x8xf32>
    %27 = vector.extract_strided_slice %2 {offsets = [0, 40], sizes = [8, 8], strides = [1, 1]} : vector<8x96xf32> to vector<8x8xf32>
    %28 = vector.extract_strided_slice %2 {offsets = [0, 72], sizes = [8, 8], strides = [1, 1]} : vector<8x96xf32> to vector<8x8xf32>
    %cst_11 = arith.constant dense<0.000000e+00> : vector<8x8xf32>
    %29 = tpu.matmul %26, %27, %cst_11 {dimension_numbers = #tpu.dot_dimension_numbers<[1], [1], [0], [0], [0, 0, 1, 0], [], []>} : vector<8x8xf32>, vector<8x8xf32>, vector<8x8xf32> -> vector<8x8xf32>
    %30 = arith.addf %29, %8 : vector<8x8xf32>
    %cst_12 = arith.constant dense<0xFF800000> : vector<8xf32>
    %31 = vector.multi_reduction <maximumf>, %30, %cst_12 [1] : vector<8x8xf32> to vector<8xf32>
    %32 = vector.shape_cast %31 : vector<8xf32> to vector<8x1xf32>
    %33 = vector.broadcast %32 : vector<8x1xf32> to vector<8x8xf32>
    %34 = arith.subf %30, %33 : vector<8x8xf32>
    %35 = math.exp %34 : vector<8x8xf32>
    %cst_13 = arith.constant dense<0.000000e+00> : vector<8xf32>
    %36 = vector.multi_reduction <add>, %35, %cst_13 [1] : vector<8x8xf32> to vector<8xf32>
    %37 = vector.shape_cast %36 : vector<8xf32> to vector<8x1xf32>
    %38 = tpu.reciprocal %37 {approx = true} : vector<8x1xf32> -> vector<8x1xf32>
    %39 = vector.broadcast %38 : vector<8x1xf32> to vector<8x8xf32>
    %40 = arith.mulf %35, %39 : vector<8x8xf32>
    %cst_14 = arith.constant dense<0.000000e+00> : vector<8x8xf32>
    %41 = tpu.matmul %40, %28, %cst_14 {dimension_numbers = #tpu.dot_dimension_numbers<[1], [0], [0], [1], [0, 0, 1, 1], [], []>} : vector<8x8xf32>, vector<8x8xf32>, vector<8x8xf32> -> vector<8x8xf32>
    %c0_15 = arith.constant 0 : index
    %c8 = arith.constant 8 : index
    %42 = vector.load %arg6[%c0_15, %c8] : memref<8x32xf32, #tpu.memory_space<vmem>>, vector<8x8xf32>
    tpu.vector_store %arg6[%c0_15, %c8], %41 {strides = array<i32>} : memref<8x32xf32, #tpu.memory_space<vmem>>, vector<8x8xf32>,
    %43 = vector.extract_strided_slice %2 {offsets = [0, 16], sizes = [8, 8], strides = [1, 1]} : vector<8x96xf32> to vector<8x8xf32>
    %44 = vector.extract_strided_slice %2 {offsets = [0, 48], sizes = [8, 8], strides = [1, 1]} : vector<8x96xf32> to vector<8x8xf32>
    %45 = vector.extract_strided_slice %2 {offsets = [0, 80], sizes = [8, 8], strides = [1, 1]} : vector<8x96xf32> to vector<8x8xf32>
    %cst_16 = arith.constant dense<0.000000e+00> : vector<8x8xf32>
    %46 = tpu.matmul %43, %44, %cst_16 {dimension_numbers = #tpu.dot_dimension_numbers<[1], [1], [0], [0], [0, 0, 1, 0], [], []>} : vector<8x8xf32>, vector<8x8xf32>, vector<8x8xf32> -> vector<8x8xf32>
    %47 = arith.addf %46, %8 : vector<8x8xf32>
    %cst_17 = arith.constant dense<0xFF800000> : vector<8xf32>
    %48 = vector.multi_reduction <maximumf>, %47, %cst_17 [1] : vector<8x8xf32> to vector<8xf32>
    %49 = vector.shape_cast %48 : vector<8xf32> to vector<8x1xf32>
    %50 = vector.broadcast %49 : vector<8x1xf32> to vector<8x8xf32>
    %51 = arith.subf %47, %50 : vector<8x8xf32>
    %52 = math.exp %51 : vector<8x8xf32>
    %cst_18 = arith.constant dense<0.000000e+00> : vector<8xf32>
    %53 = vector.multi_reduction <add>, %52, %cst_18 [1] : vector<8x8xf32> to vector<8xf32>
    %54 = vector.shape_cast %53 : vector<8xf32> to vector<8x1xf32>
    %55 = tpu.reciprocal %54 {approx = true} : vector<8x1xf32> -> vector<8x1xf32>
    %56 = vector.broadcast %55 : vector<8x1xf32> to vector<8x8xf32>
    %57 = arith.mulf %52, %56 : vector<8x8xf32>
    %cst_19 = arith.constant dense<0.000000e+00> : vector<8x8xf32>
    %58 = tpu.matmul %57, %45, %cst_19 {dimension_numbers = #tpu.dot_dimension_numbers<[1], [0], [0], [1], [0, 0, 1, 1], [], []>} : vector<8x8xf32>, vector<8x8xf32>, vector<8x8xf32> -> vector<8x8xf32>
    %c0_20 = arith.constant 0 : index
    %c16 = arith.constant 16 : index
    %59 = vector.load %arg6[%c0_20, %c16] : memref<8x32xf32, #tpu.memory_space<vmem>>, vector<8x8xf32>
    tpu.vector_store %arg6[%c0_20, %c16], %58 {strides = array<i32>} : memref<8x32xf32, #tpu.memory_space<vmem>>, vector<8x8xf32>,
    %60 = vector.extract_strided_slice %2 {offsets = [0, 24], sizes = [8, 8], strides = [1, 1]} : vector<8x96xf32> to vector<8x8xf32>
    %61 = vector.extract_strided_slice %2 {offsets = [0, 56], sizes = [8, 8], strides = [1, 1]} : vector<8x96xf32> to vector<8x8xf32>
    %62 = vector.extract_strided_slice %2 {offsets = [0, 88], sizes = [8, 8], strides = [1, 1]} : vector<8x96xf32> to vector<8x8xf32>
    %cst_21 = arith.constant dense<0.000000e+00> : vector<8x8xf32>
    %63 = tpu.matmul %60, %61, %cst_21 {dimension_numbers = #tpu.dot_dimension_numbers<[1], [1], [0], [0], [0, 0, 1, 0], [], []>} : vector<8x8xf32>, vector<8x8xf32>, vector<8x8xf32> -> vector<8x8xf32>
    %64 = arith.addf %63, %8 : vector<8x8xf32>
    %cst_22 = arith.constant dense<0xFF800000> : vector<8xf32>
    %65 = vector.multi_reduction <maximumf>, %64, %cst_22 [1] : vector<8x8xf32> to vector<8xf32>
    %66 = vector.shape_cast %65 : vector<8xf32> to vector<8x1xf32>
    %67 = vector.broadcast %66 : vector<8x1xf32> to vector<8x8xf32>
    %68 = arith.subf %64, %67 : vector<8x8xf32>
    %69 = math.exp %68 : vector<8x8xf32>
    %cst_23 = arith.constant dense<0.000000e+00> : vector<8xf32>
    %70 = vector.multi_reduction <add>, %69, %cst_23 [1] : vector<8x8xf32> to vector<8xf32>
    %71 = vector.shape_cast %70 : vector<8xf32> to vector<8x1xf32>
    %72 = tpu.reciprocal %71 {approx = true} : vector<8x1xf32> -> vector<8x1xf32>
    %73 = vector.broadcast %72 : vector<8x1xf32> to vector<8x8xf32>
    %74 = arith.mulf %69, %73 : vector<8x8xf32>
    %cst_24 = arith.constant dense<0.000000e+00> : vector<8x8xf32>
    %75 = tpu.matmul %74, %62, %cst_24 {dimension_numbers = #tpu.dot_dimension_numbers<[1], [0], [0], [1], [0, 0, 1, 1], [], []>} : vector<8x8xf32>, vector<8x8xf32>, vector<8x8xf32> -> vector<8x8xf32>
    %c0_25 = arith.constant 0 : index
    %c24 = arith.constant 24 : index
    %76 = vector.load %arg6[%c0_25, %c24] : memref<8x32xf32, #tpu.memory_space<vmem>>, vector<8x8xf32>
    tpu.vector_store %arg6[%c0_25, %c24], %75 {strides = array<i32>} : memref<8x32xf32, #tpu.memory_space<vmem>>, vector<8x8xf32>,
    %c0_26 = arith.constant 0 : index
    %c0_27 = arith.constant 0 : index
    %77 = vector.load %arg6[%c0_26, %c0_27] : memref<8x32xf32, #tpu.memory_space<vmem>>, vector<8x32xf32>
    %c0_28 = arith.constant 0 : index
    %c0_29 = arith.constant 0 : index
    %78 = vector.load %arg3[%c0_28, %c0_29] : memref<32x32xf32, #tpu.memory_space<vmem>>, vector<32x32xf32>
    %cst_30 = arith.constant dense<0.000000e+00> : vector<8x32xf32>
    %79 = tpu.matmul %77, %78, %cst_30 {dimension_numbers = #tpu.dot_dimension_numbers<[1], [0], [0], [1], [0, 0, 1, 1], [], []>} : vector<8x32xf32>, vector<32x32xf32>, vector<8x32xf32> -> vector<8x32xf32>
    %c0_31 = arith.constant 0 : index
    %c0_32 = arith.constant 0 : index
    %80 = vector.load %arg4[%c0_31, %c0_32] : memref<1x32xf32, #tpu.memory_space<vmem>>, vector<1x32xf32>
    %81 = vector.broadcast %80 : vector<1x32xf32> to vector<8x32xf32>
    %82 = arith.addf %79, %81 : vector<8x32xf32>
    %c0_33 = arith.constant 0 : index
    %c0_34 = arith.constant 0 : index
    %83 = vector.load %arg5[%c0_33, %c0_34] : memref<8x32xf32, #tpu.memory_space<vmem>>, vector<8x32xf32>
    tpu.vector_store %arg5[%c0_33, %c0_34], %82 {strides = array<i32>} : memref<8x32xf32, #tpu.memory_space<vmem>>, vector<8x32xf32>,
    return
  }
  func.func @transform_0(%arg0: i32) -> (i32, i32) {
    %c0_i32 = arith.constant 0 : i32
    %c0_i32_0 = arith.constant 0 : i32
    return %arg0, %c0_i32 : i32, i32
  }
  func.func @transform_1(%arg0: i32) -> (i32, i32) {
    %c0_i32 = arith.constant 0 : i32
    %c0_i32_0 = arith.constant 0 : i32
    %c0_i32_1 = arith.constant 0 : i32
    return %c0_i32, %c0_i32_0 : i32, i32
  }
  func.func @transform_2(%arg0: i32) -> (i32, i32) {
    %c0_i32 = arith.constant 0 : i32
    %c0_i32_0 = arith.constant 0 : i32
    %c0_i32_1 = arith.constant 0 : i32
    return %c0_i32, %c0_i32_0 : i32, i32
  }
  func.func @transform_3(%arg0: i32) -> (i32, i32) {
    %c0_i32 = arith.constant 0 : i32
    %c0_i32_0 = arith.constant 0 : i32
    %c0_i32_1 = arith.constant 0 : i32
    return %c0_i32, %c0_i32_0 : i32, i32
  }
  func.func @transform_4(%arg0: i32) -> (i32, i32) {
    %c0_i32 = arith.constant 0 : i32
    %c0_i32_0 = arith.constant 0 : i32
    return %arg0, %c0_i32 : i32, i32
  }
}

</mosaic_0001>

<bundles_post_ra>
// kernel: tpu_custom_call.1
= control target key start
LH: loop header
LB: loop body
LE: loop exit
PB: predicated region body
PF: predicated region fallthrough
CT: control target
= control target key end

     0   :  { %9 = vsyncpa [#allocation4], 0  ;;  %s1227_s0 = inlined_call_operand.hbm [shape: f32[16,32], index: 0, kind: input, shape index: {}]   ;;  %s1228_s1 = inlined_call_operand.hbm [shape: f32[32,96], index: 1, kind: input, shape index: {}]   ;;  %s1229_s2 = inlined_call_operand.hbm [shape: f32[32,32], index: 2, kind: input, shape index: {}]   ;;  %s1230_s3 = inlined_call_operand.vmem [shape: f32[1,32], index: 3, kind: input, shape index: {}]   ;;  %s1231_s4 = inlined_call_operand.hbm [shape: f32[16,32], index: 4, kind: output, shape index: {}]  }
   0x1   :  { %11 = vsyncpa [#allocation4 + $0x1], 0 }
   0x2   :  { %12 = vsyncpa [#allocation7], 0 }
   0x3   :  { %13 = vsyncpa [#allocation5], 0 }
   0x4   :  { %15 = vsyncpa [#allocation5 + $0x1], 0  ;;  %s1037_s15 = smov 0   ;;  %s1039_s16 = smov 0  }
   0x5   :  { %s1041_s17 = smov 0   ;;  %s1043_s18 = smov 0  }
   0x6 LB: > { %s152_s21 = sshll.u32 %s1228_s1, 4  ;;  %s1061_s22 = sadd.s32 4294967295, %s991_s18   ;;  %s991_s18 = sphi %s1043_s18, %s1242_s18   ;;  %s987_s17 = sphi %s1041_s17, %s1241_s17   ;;  %s983_s16 = sphi %s1039_s16, %s1240_s16   ;;  %s979_s15 = sphi %s1037_s15, %s1239_s15   ;;  %s153_s21 = int_to_ptr.hbm [resolvable:$true] %s152_s21 }
   0x7   : > { %p701_p0 = scmp.ge.s32.totalorder %s991_s18, 1  ;;  %p42_p1 = scmp.eq.s32.totalorder %s1061_s22, 0 }
   0x8   : > { %p141_p2 = scmp.lt.s32.totalorder %s991_s18, 3  ;;  %s993_s24 = smov [#allocation6]  }
   0x9   : > { %s154_s25 = sshll.u32 %s993_s24, 4  ;;  %s166_s28 = sshll.u32 %s1229_s2, 4  ;;  %s155_s25 = int_to_ptr.vmem [resolvable:$true] %s154_s25  ;;  %s167_s28 = int_to_ptr.hbm [resolvable:$true] %s166_s28 }
   0xa   : > { %p1066_p3 = pnand %p701_p0, %p141_p2  ;;  %s994_s29 = smov [#allocation8]  }
   0xb   : > { %s168_s30 = sshll.u32 %s994_s29, 4  ;;  %s995_s5 = smov 128   ;;  %s169_s30 = int_to_ptr.vmem [resolvable:$true] %s168_s30 }
   0xc   : > { %p742_p4 = pneg %p1066_p3  ;;  %s996_s6 = smov 8  }
   0xd   : > { %s700_s7 = sadd.s32 4294967294, %s991_s18   ;;  %s1080_s8 = sadd.s32 1, %s991_s18  }
   0xe   : > { %p743_p6 = pnand %p742_p4, %p42_p1  ;;  %s25_s9 = ssub.s32 %s991_s18, %s1080_s8 }
   0xf   : > { %s28_s10 = sadd.s32 1, %s987_s17  ;;  %p26_p7 = scmp.eq.s32.totalorder %s25_s9, 0 }
  0x10   : > { %745 = dma.hbm_to_vmem [thread:$0]  (!%p743_p6), %s153_s21, 512, %s155_s25, [#allocation7], %s995_s5, %s995_s5, %s996_s6  }
  0x11   : > { %748 = dma.hbm_to_vmem [thread:$0]  (!%p743_p6), %s167_s28, 512, %s169_s30, [#allocation7], %s995_s5, %s995_s5, %s996_s6  }
  0x12   : > { %p35_p8 = scmp.ne.s32.totalorder %s987_s17, %s983_s16  ;;  %p36_p9 = scmp.eq.s32.totalorder %s991_s18, 0 }
  0x13   : > { %p41_p10 = scmp.ne.s32.totalorder %s983_s16, %s979_s15  ;;  %p128_p13 = scmp.eq.s32.totalorder %s1061_s22, 1 }
  0x14   : > { %s1091_s11 = scalar_select %p26_p7, %s987_s17, %s28_s10  }
  0x15   : > { %p1093_p11 = por %p36_p9, %p35_p8  ;;  %p1099_p12 = por %p42_p1, %p41_p10 }
  0x16   : > { %p134_p0 = scmp.eq.s32.totalorder %s700_s7, 1  ;;  %p759_p2 = scmp.lt.s32.totalorder %s991_s18, 2 }
  0x17   : > { %s185_s14 = sand.u32 1, %s987_s17   ;;  %p1106_p4 = por %p128_p13, %p35_p8 }
  0x18   : > { %p1110_p6 = por %p134_p0, %p41_p10  ;;  %s705_s21 = sshll.u32 %s185_s14, 3 }
  0x19   : > { %s706_s24 = sshll.u32 %s991_s18, 3  ;;  %s189_s28 = scalar_lea.vmem [#allocation3], %s705_s21 }
  0x1a   : > { %s193_s27 = scalar_lea.hbm %s1227_s0, %s706_s24  ;;  %s197_s29 = sshll.u32 %s189_s28, 4  ;;  %s198_s29 = int_to_ptr.vmem [resolvable:$true] %s197_s29 }
  0x1b   : > { %s195_s30 = sshll.u32 %s193_s27, 4  ;;  %p1120_p7 = pnand %p759_p2, %p1093_p11  ;;  %s196_s30 = int_to_ptr.hbm [resolvable:$true] %s195_s30 }
  0x1c   : > { %s186_s6 = scalar_lea.sflag [#allocation4], %s185_s14  ;;  %s891_s7 = sshra.s32 %s196_s30, 4  ;;  %s892_s7 = int_to_ptr.hbm [resolvable:$true] %s891_s7 }
  0x1d   : > { %s893_s9 = scalar_lea.hbm %s892_s7, 8  ;;  %p895_p9 = pneg %p1120_p7 }
  0x1e   : > { %p894_p8 = scmp.ne.s32.totalorder %s892_s7, %s893_s9  ;;  %s898_s24 = scalar_lea.hbm %s1227_s0, 16 }
  0x1f   : > { %p899_p11 = scmp.lt.s32.totalorder %s892_s7, %s1227_s0  ;;  %p900_p0 = scmp.lt.s32.totalorder %s898_s24, %s893_s9 }
  0x20   : > { %p896_p10 = pnand %p895_p9, %p894_p8 }
  0x21   : > { %p901_p2 = por %p900_p0, %p899_p11 }
  0x22   : > { %p897_p13 = pneg %p896_p10 }
  0x24   : > { %p902_p5 = pnand %p901_p2, %p897_p13 }
  0x26   : > { %905 = shalt.err (!%p902_p5)
}
  0x27   : > { %752 = dma.hbm_to_vmem [thread:$0]  (!%p1120_p7), %s196_s30, 128, %s198_s29, %s186_s6  }
  0x28   : > { %206 = sbr.rel (%p1066_p3) target bundleno = 1107 (0x453), region = 36  ;;  %s1137_s14 = sand.u32 (!%p1066_p3), 1, %s983_s16  }
  0x29   : > { %s708_s26 = sshll.u32 (!%p1066_p3), %s1137_s14, 3  ;;  %s209_s27 = scalar_lea.sflag (!%p1066_p3), [#allocation4], %s1137_s14 }
  0x2a   : > { %s212_s28 = scalar_lea.vmem (!%p1066_p3), [#allocation3], %s708_s26 }
  0x2d   : > { %966 = dma.done.wait (%p1099_p12), %s209_s27, 128  }
  0x2e   : > { %968 = vsyncadd (%p1099_p12), %s209_s27, 4294967168 }
  0x2f   : > { %970 = dma.done.wait (%p42_p1), [#allocation7], 1024  }
  0x30   : > { %972 = vsyncadd (%p42_p1), [#allocation7], 4294966272  ;;  %v252_v0 = vld [vmem:[#allocation6 + $0x18] sm:$0xff]  ;;  %v251_v1 = vld [vmem:[#allocation6 + $0x10] sm:$0xff]  ;;  %vm253_vm0 = vcmask 261120   ;;  %s997_s23 = smov 72   ;;  %v277_v13 = vlaneseq }
  0x31   : > { %269 = vmatpush.msra.mxu0 %v252_v0  ;;  %v250_v2 = vld [vmem:[#allocation6 + $0x8] sm:$0xff]  ;;  %v249_v3 = vld [vmem:[#allocation6] sm:$0xff]  ;;  %v248_v4 = vld [vmem:[%s212_s28] sm:$0xff]  ;;  %s998_s13 = smov 120   ;;  %s999_s29 = smov 96   ;;  %vm286_vm1 = vcmask 64512  }
  0x32   : > { %s1000_s30 = smov 112   ;;  %s1001_s5 = smov 80   ;;  %v278_v14 = vshrl.u32 %v277_v13, 7  ;;  %v280_v15 = vand.u32 127, %v277_v13  ;;  %v1004_v16 = vmov -1e+30  }
  0x33   : > { %270 = vmatpush.msra.mxu0 %v251_v1  ;;  %s1002_s6 = smov 88   ;;  %s1003_s7 = smov 104   ;;  %vm418_vm3 = vcmask 130112   ;;  %vm489_vm4 = vcmask 195712   ;;  %vm560_vm5 = vcmask 261312  }
  0x34   : > { %vm281_vm2 = vcmp.ge.s32.totalorder %v278_v14, %v280_v15  ;;  %s1005_s9 = smov 64   ;;  %s1006_s10 = smov 40   ;;  %v814_v14 = vld [vmem:[%s1230_s3] ss:$0 sm:$0xff] }
  0x35   : > { %271 = vmatpush.msra.mxu0 %v250_v2  ;;  %v282_v17 = vsel %vm281_vm2, 0.0, %v1004_v16  ;;  %s1007_s21 = smov 56   ;;  %s1008_s24 = smov 48  }
  0x36   : > { %s1009_s25 = smov 16   ;;  %s1010_s12 = smov 8  }
  0x37   : > { %272 = vmatpush.msra.mxu0 %v249_v3  ;;  %s1011_s27 = smov 24   ;;  %s727_s28 = sshll.u32 %s1061_s22, 3 }
  0x38   : > { %712 = vmatmul.msk.f32.vlgmr.msra.gmra.mxu0 %vm253_vm0, %v248_v4  ;;  %s596_s22 = scalar_lea.sflag [#allocation5], %s1137_s14 }
  0xb5   : > { %v1152_v5 = vpop.f32.mrf.mxu0 }
  0xb6   : > { %493 = vrot.lane.b32.xlu2 %v1152_v5, %s997_s23  ;;  %349 = vrot.lane.b32.xlu1 %v1152_v5, %s998_s13 }
  0xb7   : > { %284 = vrot.lane.b32.xlu0 %v1152_v5, %s999_s29  ;;  %s606_s29 = scalar_lea.hbm %s1231_s4, %s727_s28 }
  0xbe   : > { %420 = vrot.lane.b32.xlu2 %v1152_v5, %s1000_s30  ;;  %422 = vrot.lane.b32.xlu1 %v1152_v5, %s1001_s5 }
  0xbf   : > { %351 = vrot.lane.b32.xlu0 %v1152_v5, %s1002_s6  ;;  %s247_s6 = scalar_lea.vmem [#allocation9], %s708_s26  ;;  %s941_s26 = scalar_lea.hbm %s1231_s4, 16 }
  0xc7   : > { %491 = vrot.lane.b32.xlu0 %v1152_v5, %s1003_s7  ;;  %s608_s7 = sshll.u32 %s247_s6, 4  ;;  %s609_s7 = int_to_ptr.vmem [resolvable:$true] %s608_s7 }
 0x110   : > { %v494_v6 = vpop.permute.xlu2 %493 }
 0x111   : > { %722 = vmatpush.xpose.msk.msrb.mxu0 %vm286_vm1, %v494_v6  ;;  %v566_v6 = vld [vmem:[#allocation8 + $0x18] sm:$0xff] }
 0x118   : > { %v421_v11 = vpop.permute.xlu2 %420 }
 0x128   : > { %v350_v7 = vpop.permute.xlu1 %349 }
 0x129   : > { %v285_v8 = vpop.permute.xlu0 %284 }
 0x12a   : > { %713 = vmatpush.xpose.msk.msra.mxu1 %vm286_vm1, %v285_v8  ;;  %v564_v8 = vld [vmem:[#allocation8 + $0x8] sm:$0xff] }
 0x12d   : > { %714 = vmatmul.msk.f32.vlgmr.msra.gmra.mxu1 %vm286_vm1, %v1152_v5 }
 0x130   : > { %v423_v9 = vpop.permute.xlu1 %422 }
 0x131   : > { %v352_v10 = vpop.permute.xlu0 %351  ;;  %719 = vmatpush.xpose.msk.msrb.mxu1 %vm286_vm1, %v423_v9  ;;  %v563_v9 = vld [vmem:[#allocation8] sm:$0xff] }
 0x132   : > { %716 = vmatpush.xpose.msk.msra.mxu3 %vm286_vm1, %v352_v10 }
 0x135   : > { %717 = vmatmul.msk.f32.vlgmr.msra.gmra.mxu3 %vm286_vm1, %v350_v7  ;;  %720 = vmatmul.msk.f32.vlgmr.msrb.gmra.mxu1 %vm286_vm1, %v421_v11  ;;  %v565_v7 = vld [vmem:[#allocation8 + $0x10] sm:$0xff] }
 0x136   : > { %586 = vmatpush.msra.mxu1 %v566_v6 }
 0x138   : > { %587 = vmatpush.msra.mxu1 %v565_v7 }
 0x139   : > { %v492_v12 = vpop.permute.xlu0 %491 }
 0x13a   : > { %723 = vmatmul.msk.f32.vlgmr.msrb.gmra.mxu0 %vm286_vm1, %v492_v12  ;;  %588 = vmatpush.msra.mxu1 %v564_v8 }
 0x13c   : > { %589 = vmatpush.msra.mxu1 %v563_v9 }
 0x1aa   : > { %v308_v18 = vpop.f32.mrf.mxu1 }
 0x1ab   : > { %v309_v19 = vadd.f32 %v308_v18, %v282_v17 }
 0x1ad   : > { %v311_v20 = vsel %vm286_vm1, %v309_v19, -inf }
 0x1ae   : > { %312 = vmax.xlane.f32.xlu1 %v311_v20 }
 0x1b2   : > { %v445_v21 = vpop.f32.mrf.mxu1 }
 0x1b3   : > { %v446_v22 = vadd.f32 %v445_v21, %v282_v17 }
 0x1b5   : > { %v448_v23 = vsel %vm286_vm1, %v446_v22, -inf }
 0x1b6   : > { %449 = vmax.xlane.f32.xlu0 %v448_v23 }
 0x1b7   : > { %v516_v27 = vpop.f32.mrf.mxu0 }
 0x1b8   : > { %v374_v24 = vpop.f32.mrf.mxu3  ;;  %v517_v28 = vadd.f32 %v516_v27, %v282_v17 }
 0x1b9   : > { %v375_v25 = vadd.f32 %v374_v24, %v282_v17 }
 0x1ba   : > { %v519_v29 = vsel %vm286_vm1, %v517_v28, -inf }
 0x1bb   : > { %v377_v26 = vsel %vm286_vm1, %v375_v25, -inf }
 0x1bc   : > { %378 = vmax.xlane.f32.xlu2 %v377_v26 }
 0x1c4   : > { %520 = vmax.xlane.f32.xlu2 %v519_v29 }
 0x1ca   : > { %322 = vrot.lane.b32.xlu0 %v1152_v5, %s1005_s9  ;;  %s610_s9 = sshll.u32 %s606_s29, 4  ;;  %s611_s9 = int_to_ptr.hbm [resolvable:$true] %s610_s9 }
 0x1d2   : > { %530 = vrot.lane.b32.xlu0 %v1152_v5, %s1006_s10  ;;  %s935_s10 = sshra.s32 %s611_s9, 4  ;;  %s936_s10 = int_to_ptr.hbm [resolvable:$true] %s935_s10 }
 0x1d3   : > { %p942_p12 = scmp.lt.s32.totalorder %s936_s10, %s1231_s4 }
 0x221   : > { %v313_v30 = vpop.xlane.xlu1 %312 }
 0x222   : > { %v314_v31 = vsub.f32 %v309_v19, %v313_v30 }
 0x224   : > { %v315_v32 = vmul.f32 1.442695, %v314_v31 }
 0x226   : > { %815 = vpow2.f32 %v315_v32 }
 0x229   : > { %v450_v33 = vpop.xlane.xlu0 %449 }
 0x22a   : > { %v451_v34 = vsub.f32 %v446_v22, %v450_v33 }
 0x22c   : > { %v816_v35 = vpop.eup %815  ;;  %v452_v36 = vmul.f32 1.442695, %v451_v34 }
 0x22d   : > { %v317_v37 = vsel %vm286_vm1, %v816_v35, 0.0 }
 0x22e   : > { %817 = vpow2.f32 %v452_v36  ;;  %318 = vadd.xlane.f32.xlu1 %v317_v37 }
 0x22f   : > { %v379_v38 = vpop.xlane.xlu2 %378 }
 0x230   : > { %v380_v43 = vsub.f32 %v375_v25, %v379_v38 }
 0x232   : > { %v381_v46 = vmul.f32 1.442695, %v380_v43 }
 0x234   : > { %v818_v39 = vpop.eup %817 }
 0x235   : > { %v454_v40 = vsel %vm286_vm1, %v818_v39, 0.0 }
 0x236   : > { %455 = vadd.xlane.f32.xlu1 %v454_v40 }
 0x237   : > { %v521_v41 = vpop.xlane.xlu2 %520 }
 0x238   : > { %v522_v42 = vsub.f32 %v517_v28, %v521_v41 }
 0x23a   : > { %v523_v44 = vmul.f32 1.442695, %v522_v42 }
 0x23c   : > { %819 = vpow2.f32 %v523_v44  ;;  %v323_v45 = vpop.permute.xlu0 %322 }
 0x23d   : > { %343 = vmatpush.msra.mxu2 %v323_v45  ;;  %821 = vpow2.f32 %v381_v46 }
 0x242   : > { %v820_v47 = vpop.eup %819 }
 0x243   : > { %v525_v48 = vsel %vm286_vm1, %v820_v47, 0.0  ;;  %v822_v49 = vpop.eup %821 }
 0x244   : > { %526 = vadd.xlane.f32.xlu2 %v525_v48  ;;  %v383_v50 = vsel %vm286_vm1, %v822_v49, 0.0  ;;  %v531_v58 = vpop.permute.xlu0 %530 }
 0x24c   : > { %384 = vadd.xlane.f32.xlu2 %v383_v50 }
 0x24f   : > { %388 = vrot.lane.b32.xlu1 %v1152_v5, %s1007_s21  ;;  %s937_s21 = scalar_lea.hbm %s936_s10, 8 }
 0x250   : > { %p938_p1 = scmp.ne.s32.totalorder %s936_s10, %s937_s21  ;;  %p943_p7 = scmp.lt.s32.totalorder %s941_s26, %s937_s21 }
 0x252   : > { %p939_p3 = pnand %p938_p1, %p1106_p4  ;;  %p944_p8 = por %p943_p7, %p942_p12 }
 0x254   : > { %p940_p5 = pneg %p939_p3 }
 0x256   : > { %p945_p9 = pnand %p944_p8, %p940_p5 }
 0x264   : > { %459 = vrot.lane.b32.xlu2 %v1152_v5, %s1008_s24 }
 0x2a1   : > { %v319_v51 = vpop.xlane.xlu1 %318 }
 0x2a2   : > { %823 = vrcp.f32 %v319_v51 }
 0x2a8   : > { %v824_v52 = vpop.eup %823 }
 0x2a9   : > { %v321_v53 = vmul.f32 %v824_v52, %v816_v35  ;;  %v456_v55 = vpop.xlane.xlu1 %455 }
 0x2aa   : > { %825 = vrcp.f32 %v456_v55 }
 0x2ab   : > { %715 = vmatmul.msk.f32.vlgmr.msra.gmra.mxu2 %vm286_vm1, %v321_v53 }
 0x2b0   : > { %v826_v59 = vpop.eup %825 }
 0x2b1   : > { %v458_v63 = vmul.f32 %v826_v59, %v818_v39 }
 0x2b7   : > { %v527_v54 = vpop.xlane.xlu2 %526 }
 0x2bf   : > { %v385_v56 = vpop.xlane.xlu2 %384 }
 0x2c0   : > { %827 = vrcp.f32 %v385_v56 }
 0x2c1   : > { %v389_v57 = vpop.permute.xlu1 %388  ;;  %829 = vrcp.f32 %v527_v54 }
 0x2c2   : > { %409 = vmatpush.msrb.mxu2 %v389_v57 }
 0x2c4   : > { %551 = vmatpush.msra.mxu2 %v531_v58 }
 0x2c6   : > { %v828_v60 = vpop.eup %827 }
 0x2c7   : > { %v460_v61 = vpop.permute.xlu2 %459  ;;  %v387_v62 = vmul.f32 %v828_v60, %v822_v49  ;;  %v830_v0 = vpop.eup %829 }
 0x2c8   : > { %480 = vmatpush.msrb.mxu3 %v460_v61  ;;  %v529_v1 = vmul.f32 %v830_v0, %v820_v47 }
 0x2c9   : > { %718 = vmatmul.msk.f32.vlgmr.msrb.gmra.mxu2 %vm286_vm1, %v387_v62  ;;  %721 = vmatmul.msk.f32.vlgmr.msrb.gmra.mxu3 %vm286_vm1, %v458_v63 }
 0x2d1   : > { %724 = vmatmul.msk.f32.vlgmr.msra.gmra.mxu2 %vm286_vm1, %v529_v1 }
 0x32e   : > { %v345_v2 = vpop.f32.mrf.mxu2 }
 0x32f   : > { %348 = vst.msk [vmem:[#allocation2] sm:$0xff] %vm286_vm1, %v345_v2 }
 0x34c   : > { %v411_v3 = vpop.f32.mrf.mxu2  ;;  %v482_v4 = vpop.f32.mrf.mxu3 }
 0x34d   : > { %486 = vrot.lane.b32.xlu1 %v482_v4, %s1009_s25  ;;  %415 = vrot.lane.b32.xlu0 %v411_v3, %s1010_s12 }
 0x354   : > { %v553_v5 = vpop.f32.mrf.mxu2 }
 0x355   : > { %557 = vrot.lane.b32.xlu0 %v553_v5, %s1011_s27 }
 0x3bf   : > { %v487_v10 = vpop.permute.xlu1 %486  ;;  %v416_v11 = vpop.permute.xlu0 %415 }
 0x3c0   : > { %419 = vst.msk [vmem:[#allocation2] sm:$0xff] %vm418_vm3, %v416_v11 }
 0x3c1   : > { %490 = vst.msk [vmem:[#allocation2] sm:$0xff] %vm489_vm4, %v487_v10 }
 0x3c7   : > { %v558_v12 = vpop.permute.xlu0 %557 }
 0x3c8   : > { %561 = vst.msk [vmem:[#allocation2] sm:$0xff] %vm560_vm5, %v558_v12 }
 0x3cf   : > { %v562_v13 = vld [vmem:[#allocation2] sm:$0xff] }
 0x3d0   : > { %725 = vmatmul.msk.f32.vlgmr.msra.gmra.mxu1 %vm253_vm0, %v562_v13 }
 0x44d   : > { %v591_v15 = vpop.f32.mrf.mxu1 }
 0x44e   : > { %v592_v16 = vadd.f32 %v814_v14, %v591_v15 }
 0x450   : > { %594 = vst.msk [vmem:[%s247_s6] sm:$0xff] %vm253_vm0, %v592_v16 }
 0x451   : > { %948 = shalt.err (!%p945_p9)
}
 0x452   : > { %740 = dma.vmem_to_hbm [thread:$0]  (%p1106_p4), %s609_s7, 128, %s611_s9, %s596_s22  }
 0x453 PF: > { %s622_s14 = sand.u32 1, %s979_s15   ;;  %p1238_p10 = scmp.ge.s32.totalorder %s991_s18, 2 }
 0x454   : > { %s623_s28 = scalar_lea.sflag [#allocation5], %s622_s14 }
 0x455   : > { %p754_p13 = pnand %p1238_p10, %p1110_p6 }
 0x457   : > { %p755_p11 = pneg %p754_p13 }
 0x459   : > { %974 = dma.done.wait (%p755_p11), %s623_s28, 128  }
 0x45a   : > { %976 = vsyncadd (%p755_p11), %s623_s28, 4294967168  ;;  %p18_p0 = scmp.ge.s32.totalorder %s1080_s8, 4   ;;  %s1239_s15 = smov %s983_s16 }
 0x45b   : > { %s1240_s16 = smov %s987_s17  ;;  %s1241_s17 = smov %s1091_s11 }
 0x45c   : > { %s1242_s18 = smov %s1080_s8  ;;  %20 = sbr.rel (!%p18_p0) target bundleno = 6 (0x6), region = 89 }
 0x461   :  { %629 = vsyncpa [#allocation4], 1 }
 0x462   :  { %631 = vsyncpa [#allocation4 + $0x1], 1 }
 0x463   :  { %632 = vsyncpa [#allocation7], 1 }
 0x464   :  { %633 = vsyncpa [#allocation5], 1 }
 0x465   :  { %635 = vsyncpa [#allocation5 + $0x1], 1 }

</bundles_post_ra>
